<compile_context>
chip_gen: v7x
topology: tpu7x:2x2x1
jax: 0.10.0
libtpu: 0.0.40
codegen_flags: <defaults>
</compile_context>

<pallas_src>
import functools

import numpy as np
import jax
import jax.numpy as jnp
from jax import lax
from jax.experimental import pallas as pl
from jax.experimental.pallas import tpu as pltpu


def _round_up(x, m):
    return (x + m - 1) // m * m


def _log_sigmoid(z):
    # Numerically stable log(sigmoid(z)) = min(z, 0) - log(1 + exp(-|z|)).
    # exp(-|z|) is in (0, 1], so the log argument is in (1, 2] -> no -inf/NaN.
    return jnp.minimum(z, 0.0) - jnp.log(1.0 + jnp.exp(-jnp.abs(z)))


def _nsl_kernel(x_ref, o_ref, noise_ref, sel_ref, part_ref, *,
                batch, tb, n_noise, embed, n_cols, compute_dtype, dense_eup):
    f32 = jnp.float32
    x = x_ref[...].astype(compute_dtype)                      # (tb, E)

    # Signed scores, accumulated chunk-by-chunk (never materializing a
    # (tb, (N+1)*E) intermediate):
    #   acc[b, 0]   =  <output_b, input_b>
    #   acc[b, k]   = -<noise_{b,k-1}, input_b>      k = 1..N
    #   acc[b, k>N] =  0                              (lane padding to C)
    acc = jnp.zeros((tb, n_cols), dtype=f32)
    for k in range(n_noise + 1):
        if k == 0:
            src = o_ref[...]                                   # positive pair
        else:
            src = noise_ref[:, pl.ds((k - 1) * embed, embed)]  # one noise chunk
        prod = src.astype(compute_dtype) * x                   # (tb, E)
        sel_k = sel_ref[pl.ds(k * embed, embed), :]            # (E, C), +/-1 one-hot
        acc = acc + jnp.dot(prod, sel_k, preferred_element_type=f32)

    first_row = pl.program_id(0) * tb

    if dense_eup:
        # tb is a multiple of 128 here: transpose the small score block so the
        # transcendentals run on lane-dense (C, tb) vregs.
        zt = jnp.transpose(acc)                                # (C, tb)
        col = lax.broadcasted_iota(jnp.int32, (n_cols, tb), 1)
        valid = (first_row + col) < batch
        zt = jnp.where(valid, zt, 0.0)                         # mask before transcendental
        ls = jnp.where(valid, _log_sigmoid(zt), 0.0)           # (C, tb)
        out_part = jnp.sum(ls[0:1, :])
        noise_part = jnp.sum(ls[1:n_noise + 1, :])
    else:
        row = lax.broadcasted_iota(jnp.int32, (tb, n_cols), 0)
        valid = (first_row + row) < batch
        z = jnp.where(valid, acc, 0.0)                         # mask before transcendental
        ls = jnp.where(valid, _log_sigmoid(z), 0.0)            # (tb, C)
        out_part = jnp.sum(ls[:, 0:1])
        noise_part = jnp.sum(ls[:, 1:n_noise + 1])

    # One full (8,128) f32 vreg per grid step: [0,0] = positive partial,
    # [0,1] = noise partial -> single unmasked vector store; the wrapper
    # column-sums the per-tile partials.
    sub = lax.broadcasted_iota(jnp.int32, (8, 128), 0)
    lane = lax.broadcasted_iota(jnp.int32, (8, 128), 1)
    part_ref[...] = jnp.where(
        (sub == 0) & (lane == 0), out_part,
        jnp.where((sub == 0) & (lane == 1), noise_part, 0.0))


def _vmem_capacity_bytes(default=64 * 1024 * 1024):
    # Generation-aware physical VMEM (v7x: 64 MiB, v5e/v6e: 128 MiB).
    try:
        info = pltpu.get_tpu_info()
        cap = getattr(info, "vmem_capacity_bytes", None)
        if cap:
            return int(cap)
    except Exception:
        pass
    return default


def _build_sel(n_noise, embed, n_cols, dtype):
    # ((N+1)*E, C) block "diagonal": row-block 0 (positive) -> +1 in column 0,
    # row-block k>=1 (noise k-1) -> -1 in column k. Columns N+1..C-1 are zero.
    rows = (n_noise + 1) * embed
    k_of_row = np.arange(rows) // embed
    col = np.arange(n_cols)
    sel = (k_of_row[:, None] == col[None, :]).astype(np.float32)
    sel[embed:, :] *= -1.0
    return jnp.asarray(sel, dtype=dtype)


def negative_sample_loss(input_vectors, output_vectors, noise_vectors, *,
                         tb=None, compute_dtype=None):
    B, E = input_vectors.shape
    Bn, N, En = noise_vectors.shape
    assert Bn == B and En == E

    store_itemsize = jnp.dtype(input_vectors.dtype).itemsize
    if compute_dtype is None:
        # bf16 storage -> bf16 multiply/matmul with f32 accumulation (v6e/v7x
        # native).  Pass compute_dtype=jnp.float32 on v5e (no bf16 VPU path).
        compute_dtype = (jnp.bfloat16 if input_vectors.dtype == jnp.bfloat16
                         else jnp.float32)
    comp_itemsize = jnp.dtype(compute_dtype).itemsize

    C = _round_up(N + 1, 8)            # score columns: positive + N noise + pad

    # Generation-aware VMEM limit and tile budget.
    phys_vmem = _vmem_capacity_bytes()
    vmem_limit = int(min(phys_vmem * 3 // 4, 100 * 1024 * 1024))
    tile_budget = vmem_limit // 2      # headroom for Pallas internals

    # VMEM bytes per batch row: double-buffered storage tiles PLUS in-kernel
    # intermediates (x cast, per-chunk src/product, accumulator, transposed
    # scores and log-sigmoid temporaries).
    per_row = (2 * (N + 2) * E * store_itemsize    # x, o, noise tiles (2 bufs)
               + 3 * comp_itemsize * E             # x cast + chunk src & product
               + 16 * C)                           # f32 acc / zt / ls temps
    fixed = (2 * (N + 1) * E * C * comp_itemsize   # hoisted selection matrix
             + 2 * 8 * 128 * 4)                    # (8,128) partial-sum tiles
    rows = int(max(8, min((tile_budget - fixed) // per_row, 8192)))

    if tb is None:
        tb = rows
    gran = 128 if B >= 256 else 8
    if B >= 2 * gran:
        # Keep >= 2 grid steps so the "parallel" batch axis can shard across
        # both v7x TensorCores.
        tb = min(tb, _round_up((B + 1) // 2, gran))
    if tb >= B:
        tb = B                          # single block; block dim == array dim
    else:
        tb = max(gran, (tb // gran) * gran)   # multiple of gran; partial edge block masked
    num_tiles = -(-B // tb)
    dense_eup = (tb % 128 == 0)

    noise2d = noise_vectors.reshape(B, N * E)   # lane-dense, layout-free reshape
    sel = _build_sel(N, E, C, compute_dtype)

    kernel = functools.partial(
        _nsl_kernel, batch=B, tb=tb, n_noise=N, embed=E, n_cols=C,
        compute_dtype=compute_dtype, dense_eup=dense_eup)

    cost = pl.CostEstimate(
        flops=int(2 * B * E * (N + 1) * (C + 1)),
        transcendentals=int(2 * num_tiles * tb * C),
        bytes_accessed=int(B * (N + 2) * E * store_itemsize
                           + (N + 1) * E * C * comp_itemsize
                           + num_tiles * 8 * 128 * 4),
    )

    partials = pl.pallas_call(
        kernel,
        out_shape=jax.ShapeDtypeStruct((num_tiles * 8, 128), jnp.float32),
        grid=(num_tiles,),
        in_specs=[
            pl.BlockSpec((tb, E), lambda t: (t, 0)),
            pl.BlockSpec((tb, E), lambda t: (t, 0)),
            pl.BlockSpec((tb, N * E), lambda t: (t, 0)),
            pl.BlockSpec(((N + 1) * E, C), lambda t: (0, 0)),  # constant: fetched once
        ],
        out_specs=pl.BlockSpec((8, 128), lambda t: (t, 0)),
        compiler_params=pltpu.CompilerParams(
            dimension_semantics=("parallel",),
            vmem_limit_bytes=vmem_limit,
        ),
        cost_estimate=cost,
    )(input_vectors, output_vectors, noise2d, sel)

    out_sum = jnp.sum(partials[:, 0])      # sum_b log(sigmoid(<o_b, x_b>))
    noise_sum = jnp.sum(partials[:, 1])    # sum_{b,n} log(sigmoid(-<noise, x>))
    return -(out_sum / B + noise_sum)


def _reference(input_vectors, output_vectors, noise_vectors):
    x = input_vectors.astype(jnp.float32)
    o = output_vectors.astype(jnp.float32)
    nz = noise_vectors.astype(jnp.float32)
    out_loss = jnp.log(jax.nn.sigmoid(jnp.sum(o * x, axis=-1)))                       # (B,)
    noise_loss = jnp.sum(jnp.log(jax.nn.sigmoid(-jnp.sum(nz * x[:, None, :], axis=-1))))
    return -jnp.mean(out_loss + noise_loss)   # broadcast + mean, exactly as in torch


if __name__ == "__main__":
    BATCH_SIZE = 5   # matches the module's BATCH_SIZE
    EMBED = 32
    N_NOISE = 4

    key = jax.random.PRNGKey(0)
    k1, k2, k3 = jax.random.split(key, 3)
    input_vectors = jax.random.normal(k1, (BATCH_SIZE, EMBED), dtype=jnp.float32)
    output_vectors = jax.random.normal(k2, (BATCH_SIZE, EMBED), dtype=jnp.float32)
    noise_vectors = jax.random.normal(k3, (BATCH_SIZE, N_NOISE, EMBED), dtype=jnp.float32)

    loss = negative_sample_loss(input_vectors, output_vectors, noise_vectors)
    loss = jax.block_until_ready(loss)

    ref = _reference(input_vectors, output_vectors, noise_vectors)
    assert jnp.allclose(loss, ref, rtol=1e-4, atol=1e-5), (loss, ref)

    print("KERNEL_OK")
</pallas_src>

<mosaic_0001>
module attributes {stable_mosaic.version = 11 : i64} {
  func.func @_nsl_kernel(%arg0: i32, %arg1: memref<5x32xf32, #tpu.memory_space<vmem>>, %arg2: memref<5x32xf32, #tpu.memory_space<vmem>>, %arg3: memref<5x128xf32, #tpu.memory_space<vmem>>, %arg4: memref<160x8xf32, #tpu.memory_space<vmem>>, %arg5: memref<8x128xf32, #tpu.memory_space<vmem>>) attributes {dimension_semantics = [#tpu.dimension_semantics<parallel>], iteration_bounds = array<i64: 1>, scalar_prefetch = 0 : i64, scratch_operands = 0 : i64, tpu.core_type = #tpu.core_type<tc>, window_params = [{transform_indices = @transform_0, window_bounds = array<i64: 5, 32>}, {transform_indices = @transform_1, window_bounds = array<i64: 5, 32>}, {transform_indices = @transform_2, window_bounds = array<i64: 5, 128>}, {pipeline_mode = #tpu.pipeline_mode<synchronous>, transform_indices = @transform_3, window_bounds = array<i64: 160, 8>}, {transform_indices = @transform_4, window_bounds = array<i64: 8, 128>}]} {
    %c0 = arith.constant 0 : index
    %c0_0 = arith.constant 0 : index
    %0 = vector.load %arg1[%c0, %c0_0] : memref<5x32xf32, #tpu.memory_space<vmem>>, vector<5x32xf32>
    %cst = arith.constant 0.000000e+00 : f32
    %1 = vector.broadcast %cst : f32 to vector<5x8xf32>
    %c0_1 = arith.constant 0 : index
    %c0_2 = arith.constant 0 : index
    %2 = vector.load %arg2[%c0_1, %c0_2] : memref<5x32xf32, #tpu.memory_space<vmem>>, vector<5x32xf32>
    %3 = arith.mulf %2, %0 : vector<5x32xf32>
    %c0_3 = arith.constant 0 : index
    %c0_4 = arith.constant 0 : index
    %4 = vector.load %arg4[%c0_3, %c0_4] : memref<160x8xf32, #tpu.memory_space<vmem>>, vector<32x8xf32>
    %cst_5 = arith.constant dense<0.000000e+00> : vector<5x8xf32>
    %5 = tpu.matmul %3, %4, %cst_5 {dimension_numbers = #tpu.dot_dimension_numbers<[1], [0], [0], [1], [0, 0, 1, 1], [], []>} : vector<5x32xf32>, vector<32x8xf32>, vector<5x8xf32> -> vector<5x8xf32>
    %6 = arith.addf %1, %5 : vector<5x8xf32>
    %c0_6 = arith.constant 0 : index
    %c0_7 = arith.constant 0 : index
    %7 = vector.load %arg3[%c0_6, %c0_7] : memref<5x128xf32, #tpu.memory_space<vmem>>, vector<5x32xf32>
    %8 = arith.mulf %7, %0 : vector<5x32xf32>
    %c32 = arith.constant 32 : index
    %c0_8 = arith.constant 0 : index
    %9 = vector.load %arg4[%c32, %c0_8] : memref<160x8xf32, #tpu.memory_space<vmem>>, vector<32x8xf32>
    %cst_9 = arith.constant dense<0.000000e+00> : vector<5x8xf32>
    %10 = tpu.matmul %8, %9, %cst_9 {dimension_numbers = #tpu.dot_dimension_numbers<[1], [0], [0], [1], [0, 0, 1, 1], [], []>} : vector<5x32xf32>, vector<32x8xf32>, vector<5x8xf32> -> vector<5x8xf32>
    %11 = arith.addf %6, %10 : vector<5x8xf32>
    %c0_10 = arith.constant 0 : index
    %c32_11 = arith.constant 32 : index
    %12 = vector.load %arg3[%c0_10, %c32_11] : memref<5x128xf32, #tpu.memory_space<vmem>>, vector<5x32xf32>
    %13 = arith.mulf %12, %0 : vector<5x32xf32>
    %c64 = arith.constant 64 : index
    %c0_12 = arith.constant 0 : index
    %14 = vector.load %arg4[%c64, %c0_12] : memref<160x8xf32, #tpu.memory_space<vmem>>, vector<32x8xf32>
    %cst_13 = arith.constant dense<0.000000e+00> : vector<5x8xf32>
    %15 = tpu.matmul %13, %14, %cst_13 {dimension_numbers = #tpu.dot_dimension_numbers<[1], [0], [0], [1], [0, 0, 1, 1], [], []>} : vector<5x32xf32>, vector<32x8xf32>, vector<5x8xf32> -> vector<5x8xf32>
    %16 = arith.addf %11, %15 : vector<5x8xf32>
    %c0_14 = arith.constant 0 : index
    %c64_15 = arith.constant 64 : index
    %17 = vector.load %arg3[%c0_14, %c64_15] : memref<5x128xf32, #tpu.memory_space<vmem>>, vector<5x32xf32>
    %18 = arith.mulf %17, %0 : vector<5x32xf32>
    %c96 = arith.constant 96 : index
    %c0_16 = arith.constant 0 : index
    %19 = vector.load %arg4[%c96, %c0_16] : memref<160x8xf32, #tpu.memory_space<vmem>>, vector<32x8xf32>
    %cst_17 = arith.constant dense<0.000000e+00> : vector<5x8xf32>
    %20 = tpu.matmul %18, %19, %cst_17 {dimension_numbers = #tpu.dot_dimension_numbers<[1], [0], [0], [1], [0, 0, 1, 1], [], []>} : vector<5x32xf32>, vector<32x8xf32>, vector<5x8xf32> -> vector<5x8xf32>
    %21 = arith.addf %16, %20 : vector<5x8xf32>
    %c0_18 = arith.constant 0 : index
    %c96_19 = arith.constant 96 : index
    %22 = vector.load %arg3[%c0_18, %c96_19] : memref<5x128xf32, #tpu.memory_space<vmem>>, vector<5x32xf32>
    %23 = arith.mulf %22, %0 : vector<5x32xf32>
    %c128 = arith.constant 128 : index
    %c0_20 = arith.constant 0 : index
    %24 = vector.load %arg4[%c128, %c0_20] : memref<160x8xf32, #tpu.memory_space<vmem>>, vector<32x8xf32>
    %cst_21 = arith.constant dense<0.000000e+00> : vector<5x8xf32>
    %25 = tpu.matmul %23, %24, %cst_21 {dimension_numbers = #tpu.dot_dimension_numbers<[1], [0], [0], [1], [0, 0, 1, 1], [], []>} : vector<5x32xf32>, vector<32x8xf32>, vector<5x8xf32> -> vector<5x8xf32>
    %26 = arith.addf %21, %25 : vector<5x8xf32>
    %c5_i32 = arith.constant 5 : i32
    %27 = arith.muli %arg0, %c5_i32 : i32
    %28 = tpu.iota {dimensions = array<i32: 0>} : vector<5x8xi32>
    %29 = vector.broadcast %27 : i32 to vector<5x8xi32>
    %30 = arith.addi %29, %28 : vector<5x8xi32>
    %c5_i32_22 = arith.constant 5 : i32
    %31 = vector.broadcast %c5_i32_22 : i32 to vector<5x8xi32>
    %32 = arith.cmpi slt, %30, %31 : vector<5x8xi32>
    %cst_23 = arith.constant 0.000000e+00 : f32
    %33 = vector.broadcast %cst_23 : f32 to vector<5x8xf32>
    %34 = arith.select %32, %26, %33 : vector<5x8xi1>, vector<5x8xf32>
    %cst_24 = arith.constant 0.000000e+00 : f32
    %35 = vector.broadcast %cst_24 : f32 to vector<5x8xf32>
    %36 = arith.minimumf %34, %35 : vector<5x8xf32>
    %37 = math.absf %34 : vector<5x8xf32>
    %cst_25 = arith.constant 0.000000e+00 : f32
    %38 = vector.broadcast %cst_25 : f32 to vector<5x8xf32>
    %39 = arith.subf %38, %37 : vector<5x8xf32>
    %40 = math.exp %39 : vector<5x8xf32>
    %cst_26 = arith.constant 1.000000e+00 : f32
    %41 = vector.broadcast %cst_26 : f32 to vector<5x8xf32>
    %42 = arith.addf %41, %40 : vector<5x8xf32>
    %43 = math.log %42 : vector<5x8xf32>
    %44 = arith.subf %36, %43 : vector<5x8xf32>
    %cst_27 = arith.constant 0.000000e+00 : f32
    %45 = vector.broadcast %cst_27 : f32 to vector<5x8xf32>
    %46 = arith.select %32, %44, %45 : vector<5x8xi1>, vector<5x8xf32>
    %47 = vector.extract_strided_slice %46 {offsets = [0, 0], sizes = [5, 1], strides = [1, 1]} : vector<5x8xf32> to vector<5x1xf32>
    %48 = vector.shape_cast %47 : vector<5x1xf32> to vector<1x5x1xf32>
    %cst_28 = arith.constant dense<0.000000e+00> : vector<1xf32>
    %49 = vector.multi_reduction <add>, %48, %cst_28 [1, 2] : vector<1x5x1xf32> to vector<1xf32>
    %50 = vector.shape_cast %49 : vector<1xf32> to vector<1x1x1xf32>
    %51 = vector.extract %50[0, 0, 0] : f32 from vector<1x1x1xf32>
    %52 = vector.extract_strided_slice %46 {offsets = [0, 1], sizes = [5, 4], strides = [1, 1]} : vector<5x8xf32> to vector<5x4xf32>
    %53 = vector.shape_cast %52 : vector<5x4xf32> to vector<1x5x4xf32>
    %cst_29 = arith.constant dense<0.000000e+00> : vector<1xf32>
    %54 = vector.multi_reduction <add>, %53, %cst_29 [1, 2] : vector<1x5x4xf32> to vector<1xf32>
    %55 = vector.shape_cast %54 : vector<1xf32> to vector<1x1x1xf32>
    %56 = vector.extract %55[0, 0, 0] : f32 from vector<1x1x1xf32>
    %57 = tpu.iota {dimensions = array<i32: 0>} : vector<8x128xi32>
    %58 = tpu.iota {dimensions = array<i32: 1>} : vector<8x128xi32>
    %c0_i32 = arith.constant 0 : i32
    %59 = vector.broadcast %c0_i32 : i32 to vector<8x128xi32>
    %60 = arith.cmpi eq, %57, %59 : vector<8x128xi32>
    %c0_i32_30 = arith.constant 0 : i32
    %61 = vector.broadcast %c0_i32_30 : i32 to vector<8x128xi32>
    %62 = arith.cmpi eq, %58, %61 : vector<8x128xi32>
    %63 = arith.andi %60, %62 : vector<8x128xi1>
    %c0_i32_31 = arith.constant 0 : i32
    %64 = vector.broadcast %c0_i32_31 : i32 to vector<8x128xi32>
    %65 = arith.cmpi eq, %57, %64 : vector<8x128xi32>
    %c1_i32 = arith.constant 1 : i32
    %66 = vector.broadcast %c1_i32 : i32 to vector<8x128xi32>
    %67 = arith.cmpi eq, %58, %66 : vector<8x128xi32>
    %68 = arith.andi %65, %67 : vector<8x128xi1>
    %cst_32 = arith.constant 0.000000e+00 : f32
    %69 = vector.broadcast %56 : f32 to vector<8x128xf32>
    %70 = vector.broadcast %cst_32 : f32 to vector<8x128xf32>
    %71 = arith.select %68, %69, %70 : vector<8x128xi1>, vector<8x128xf32>
    %72 = vector.broadcast %51 : f32 to vector<8x128xf32>
    %73 = arith.select %63, %72, %71 : vector<8x128xi1>, vector<8x128xf32>
    %c0_33 = arith.constant 0 : index
    %c0_34 = arith.constant 0 : index
    %74 = vector.load %arg5[%c0_33, %c0_34] : memref<8x128xf32, #tpu.memory_space<vmem>>, vector<8x128xf32>
    tpu.vector_store %arg5[%c0_33, %c0_34], %73 {strides = array<i32>} : memref<8x128xf32, #tpu.memory_space<vmem>>, vector<8x128xf32>,
    return
  }
  func.func @transform_0(%arg0: i32) -> (i32, i32) {
    %c0_i32 = arith.constant 0 : i32
    %c0_i32_0 = arith.constant 0 : i32
    return %arg0, %c0_i32 : i32, i32
  }
  func.func @transform_1(%arg0: i32) -> (i32, i32) {
    %c0_i32 = arith.constant 0 : i32
    %c0_i32_0 = arith.constant 0 : i32
    return %arg0, %c0_i32 : i32, i32
  }
  func.func @transform_2(%arg0: i32) -> (i32, i32) {
    %c0_i32 = arith.constant 0 : i32
    %c0_i32_0 = arith.constant 0 : i32
    return %arg0, %c0_i32 : i32, i32
  }
  func.func @transform_3(%arg0: i32) -> (i32, i32) {
    %c0_i32 = arith.constant 0 : i32
    %c0_i32_0 = arith.constant 0 : i32
    %c0_i32_1 = arith.constant 0 : i32
    return %c0_i32, %c0_i32_0 : i32, i32
  }
  func.func @transform_4(%arg0: i32) -> (i32, i32) {
    %c0_i32 = arith.constant 0 : i32
    %c0_i32_0 = arith.constant 0 : i32
    return %arg0, %c0_i32 : i32, i32
  }
}

</mosaic_0001>

<bundles_post_ra>
// kernel: tpu_custom_call.1
= control target key start
LH: loop header
LB: loop body
LE: loop exit
PB: predicated region body
PF: predicated region fallthrough
CT: control target
= control target key end

     0   :  { %s662_s17 = smov 32   ;;  %s663_s24 = smov 96   ;;  %v664_v4 = vmov 0.0|0.0   ;;  %vm665_vm0 = vmmov 0   ;;  %v666_v12 = vmov 0.0   ;;  %s809_s0 = inlined_call_operand.vmem [shape: f32[5,32], index: 0, kind: input, shape index: {}]   ;;  %s810_s1 = inlined_call_operand.vmem [shape: f32[5,32], index: 1, kind: input, shape index: {}]   ;;  %s811_s2 = inlined_call_operand.vmem [shape: f32[5,128], index: 2, kind: input, shape index: {}]   ;;  %s812_s3 = inlined_call_operand.vmem [shape: f32[160,8], index: 3, kind: input, shape index: {}]   ;;  %s813_s4 = inlined_call_operand.hbm [shape: f32[8,128], index: 4, kind: output, shape index: {}]  }
   0x1   :  { %v18_v0 = vld [vmem:[%s809_s0] sm:$0x1f]  ;;  %v28_v2 = vld [vmem:[%s812_s3 + $0x28] sm:$0xff]  ;;  %585 = vmatprep.subr.bf16.mxu1 %v664_v4  ;;  %v29_v7 = vld [vmem:[%s812_s3 + $0x30] sm:$0xff]  ;;  %597 = vmatprep.subr.bf16.mxu0 %v664_v4 }
   0x2   :  { %179 = vrot.lane.b32.xlu0 %v18_v0, %s662_s17  ;;  %v27_v1 = vld [vmem:[%s812_s3 + $0x20] sm:$0xff]  ;;  %347 = vrot.lane.b32.xlu1 %v18_v0, %s663_s24  ;;  %v184_v6 = vld [vmem:[%s812_s3 + $0x48] sm:$0xff] }
   0x3   :  { %v183_v3 = vld [vmem:[%s812_s3 + $0x40] sm:$0xff]  ;;  %v586_v5 = vpack.c.bf16 %v28_v2, %v27_v1  ;;  %v30_v8 = vld [vmem:[%s812_s3 + $0x38] sm:$0xff]  ;;  %v185_v10 = vld [vmem:[%s812_s3 + $0x50] sm:$0xff]  ;;  %538 = vmatprep.mubr.msk.f32.mxu1 %vm665_vm0, %v666_v12 }
   0x4   :  { %v598_v9 = vpack.c.bf16 %v184_v6, %v183_v3  ;;  %v186_v11 = vld [vmem:[%s812_s3 + $0x58] sm:$0xff] }
   0x5   :  { %9 = vsyncpa [#allocation3], 0  ;;  %587 = vmatpush3.bf16.msra.mxu1 %v586_v5  ;;  %v589_v13 = vpack.c.bf16 %v30_v8, %v29_v7  ;;  %560 = vmatprep.mubr.msk.f32.mxu0 %vm665_vm0, %v666_v12  ;;  %s667_s8 = smov 64   ;;  %v601_v14 = vpack.c.bf16 %v186_v11, %v185_v10  ;;  %v25_v15 = vld [vmem:[%s811_s2] sm:$0x1f]  ;;  %v22_v18 = vld [vmem:[%s812_s3 + $0x8] sm:$0xff]  ;;  %v432_v48 = vlaneseq }
   0x6   :  { %263 = vrot.lane.b32.xlu0 %v18_v0, %s667_s8  ;;  %599 = vmatpush3.bf16.msra.mxu0 %v598_v9  ;;  %v26_v16 = vmul.f32 %v25_v15, %v18_v0  ;;  %v21_v17 = vld [vmem:[%s812_s3] sm:$0xff]  ;;  %vm31_vm1 = vcmask 261120   ;;  %v23_v20 = vld [vmem:[%s812_s3 + $0x10] sm:$0xff]  ;;  %v24_v21 = vld [vmem:[%s812_s3 + $0x18] sm:$0xff]  ;;  %vm448_vm3 = vcmask 4096   ;;  %vm463_vm4 = vcmask 28672  }
   0x7   :  { %588 = vmatprep.subr.bf16.mxu1 %v664_v4  ;;  %600 = vmatprep.subr.bf16.mxu0 %v664_v4  ;;  %v592_v19 = vpack.c.bf16 %v22_v18, %v21_v17  ;;  %v595_v22 = vpack.c.bf16 %v24_v21, %v23_v20  ;;  %v19_v23 = vld [vmem:[%s810_s1] sm:$0x1f]  ;;  %v268_v32 = vld [vmem:[%s812_s3 + $0x68] sm:$0xff]  ;;  %v269_v34 = vld [vmem:[%s812_s3 + $0x70] sm:$0xff]  ;;  %v433_v49 = vshrl.u32 %v432_v48, 7  ;;  %v475_v17 = vand.u32 127, %v432_v48 }
   0x8   :  { %v20_v24 = vmul.f32 %v19_v23, %v18_v0  ;;  %v267_v31 = vld [vmem:[%s812_s3 + $0x60] sm:$0xff]  ;;  %v270_v35 = vld [vmem:[%s812_s3 + $0x78] sm:$0xff]  ;;  %v352_v39 = vld [vmem:[%s812_s3 + $0x88] sm:$0xff]  ;;  %s669_s9 = smov [#allocation2]  }
   0x9   :  { %590 = vmatpush3.bf16.msra.mxu1 %v589_v13  ;;  %v604_v33 = vpack.c.bf16 %v268_v32, %v267_v31  ;;  %v607_v37 = vpack.c.bf16 %v270_v35, %v269_v34  ;;  %v351_v38 = vld [vmem:[%s812_s3 + $0x80] sm:$0xff]  ;;  %v353_v42 = vld [vmem:[%s812_s3 + $0x90] sm:$0xff]  ;;  %v354_v43 = vld [vmem:[%s812_s3 + $0x98] sm:$0xff]  ;;  %vm436_vm2 = vcmp.lt.s32.totalorder %v433_v49, 5  ;;  %s668_s3 = smov 127   ;;  %vm476_vm5 = vcmp.eq.s32.totalorder %v433_v49, 0 }
   0xa   :  { %602 = vmatpush3.bf16.msra.mxu0 %v601_v14  ;;  %591 = vmatprep.subr.bf16.mxu1 %v664_v4  ;;  %v610_v41 = vpack.c.bf16 %v352_v39, %v351_v38  ;;  %v613_v44 = vpack.c.bf16 %v354_v43, %v353_v42  ;;  %vm479_vm6 = vcmp.eq.s32.totalorder %v475_v17, 1  ;;  %vm477_vm7 = vcmp.eq.s32.totalorder %v475_v17, 0  ;;  %s492_s10 = sshll.u32 %s669_s9, 4  ;;  %s493_s10 = int_to_ptr.vmem [resolvable:$true] %s492_s10 }
   0xb   :  { %603 = vmatprep.subr.bf16.mxu0 %v664_v4  ;;  %vm480_vm8 = vmand %vm476_vm5, %vm479_vm6  ;;  %s638_s12 = scalar_lea.vmem %s493_s10, 128  ;;  %p643_p1 = scmp.lt.s32.totalorder %s493_s10, %s493_s10 }
   0xc   :  { %539 = vmatmul.mubr.msk.f32.vlgmr.msra.gmra.mrb[0].mxu1 %vm31_vm1, %v26_v16  ;;  %vm478_vm9 = vmand %vm476_vm5, %vm477_vm7  ;;  %p639_p0 = scmp.ne.s32.totalorder %s493_s10, %s638_s12  ;;  %p644_p2 = scmp.lt.s32.totalorder %s638_s12, %s638_s12 }
   0xd   :  { %593 = vmatpush3.bf16.msra.mxu1 %v592_v19  ;;  %549 = vmatprep.mubr.msk.f32.mxu1 %vm665_vm0, %v666_v12 }
   0xe   :  { %594 = vmatprep.subr.bf16.mxu1 %v664_v4  ;;  %p645_p3 = por %p644_p2, %p643_p1 }
  0x10   :  { %p646_p4 = pnand %p645_p3, %p639_p0 }
  0x11   :  { %596 = vmatpush3.bf16.msra.mxu1 %v595_v22 }
  0x14   :  { %550 = vmatmul.mubr.msk.f32.vlgmr.msra.gmra.mrb[0].mxu1 %vm31_vm1, %v20_v24 }
  0x74   :  { %v180_v25 = vpop.permute.xlu0 %179  ;;  %v348_v27 = vpop.permute.xlu1 %347 }
  0x75   :  { %v182_v26 = vmul.f32 %v180_v25, %v25_v15  ;;  %v350_v28 = vmul.f32 %v348_v27, %v25_v15 }
  0x77   :  { %188 = vrot.lane.b32.xlu1 %v182_v26, %s663_s24 }
  0x78   :  { %v264_v29 = vpop.permute.xlu0 %263 }
  0x79   :  { %v266_v30 = vmul.f32 %v264_v29, %v25_v15 }
  0x7b   :  { %272 = vrot.lane.b32.xlu0 %v266_v30, %s667_s8  ;;  %356 = vrot.lane.b32.xlu1 %v350_v28, %s662_s17 }
  0xe7   :  { %v174_v46 = vpop.f32.mrb[0].mxu1 }
  0xe8   :  { %v551_v47 = vpop.f32.mrb[1].mxu1 }
  0xe9   :  { %v189_v36 = vpop.permute.xlu1 %188 }
  0xea   :  { %561 = vmatmul.mubr.msk.f32.vlgmr.msra.gmra.mrb[0].mxu0 %vm31_vm1, %v189_v36 }
  0xeb   :  { %605 = vmatpush3.bf16.msra.mxu0 %v604_v33  ;;  %571 = vmatprep.mubr.msk.f32.mxu0 %vm665_vm0, %v666_v12 }
  0xec   :  { %606 = vmatprep.subr.bf16.mxu0 %v664_v4 }
  0xed   :  { %v273_v40 = vpop.permute.xlu0 %272  ;;  %v357_v45 = vpop.permute.xlu1 %356 }
  0xef   :  { %608 = vmatpush3.bf16.msra.mxu0 %v607_v37 }
  0xf0   :  { %609 = vmatprep.subr.bf16.mxu0 %v664_v4 }
  0xf2   :  { %572 = vmatmul.mubr.msk.f32.vlgmr.msra.gmra.mrb[0].mxu0 %vm31_vm1, %v273_v40 }
  0xf3   :  { %611 = vmatpush3.bf16.msra.mxu0 %v610_v41  ;;  %582 = vmatprep.mubr.msk.f32.mxu0 %vm665_vm0, %v666_v12 }
  0xf4   :  { %612 = vmatprep.subr.bf16.mxu0 %v664_v4 }
  0xf7   :  { %614 = vmatpush3.bf16.msra.mxu0 %v613_v44 }
  0xfa   :  { %583 = vmatmul.mubr.msk.f32.vlgmr.msra.gmra.mrb[0].mxu0 %vm31_vm1, %v357_v45 }
 0x1cd   :  { %v426_v50 = vpop.f32.mrb[0].mxu0 }
 0x1ce   :  { %v615_v51 = vadd.f32 %v426_v50, %v174_v46  ;;  %v584_v52 = vpop.f32.mrb[1].mxu0 }
 0x1d0   :  { %v437_v53 = vsel %vm436_vm2, %v615_v51, 0.0 }
 0x1d1   :  { %v439_v54 = vand.u32 2147483647, %v437_v53  ;;  %v438_v60 = vmin.f32 %v437_v53, 0.0 }
 0x1d3   :  { %v440_v55 = vsub.f32 0.0, %v439_v54 }
 0x1d5   :  { %v441_v56 = vmul.f32 1.442695, %v440_v55 }
 0x1d7   :  { %634 = vpow2.f32 %v441_v56 }
 0x1e1   :  { %v635_v57 = vpop.eup %634 }
 0x1e2   :  { %v443_v58 = vadd.f32 1.0, %v635_v57 }
 0x1e4   :  { %636 = vlog2.f32 %v443_v58 }
 0x1ee   :  { %v637_v59 = vpop.eup %636 }
 0x1ef   :  { %v445_v61 = vmul.f32 0.6931472, %v637_v59 }
 0x1f1   :  { %v446_v62 = vsub.f32 %v438_v60, %v445_v61 }
 0x1f3   :  { %v447_v63 = vsel %vm436_vm2, %v446_v62, 0.0 }
 0x1f4   :  { %460 = vrot.lane.b32.xlu0 %v447_v63, %s668_s3  ;;  %v449_v0 = vsel %vm448_vm3, %v447_v63, 0.0 }
 0x1f5   :  { %450 = vadd.xlane.f32.xlu1 %v449_v0 }
 0x266   :  { %v461_v1 = vpop.permute.xlu0 %460 }
 0x267   :  { %v464_v2 = vsel %vm463_vm4, %v461_v1, 0.0 }
 0x268   :  { %465 = vadd.xlane.f32.xlu0 %v464_v2 }
 0x282   :  { %v451_v3 = vpop.xlane.xlu1 %450 }
 0x283   :  { %v452_v4 = vrot.slane %v451_v3, 4 }
 0x285   :  { %v453_v5 = vadd.f32 %v452_v4, %v451_v3 }
 0x287   :  { %v454_v6 = vrot.slane %v453_v5, 2 }
 0x289   :  { %v455_v7 = vadd.f32 %v454_v6, %v453_v5 }
 0x28b   :  { %v456_v8 = vrot.slane %v455_v7, 1 }
 0x28d   :  { %v457_v9 = vadd.f32 %v456_v8, %v455_v7 }
 0x28f   :  { %622 = vpush %v457_v9 }
 0x2c0   :  { %s623_s8 = spop %622 }
 0x2c1   :  { %v483_v19 = vstv %s623_s8 }
 0x2f5   :  { %v466_v10 = vpop.xlane.xlu0 %465 }
 0x2f6   :  { %v467_v11 = vrot.slane %v466_v10, 4 }
 0x2f8   :  { %v468_v12 = vadd.f32 %v467_v11, %v466_v10 }
 0x2fa   :  { %v469_v13 = vrot.slane %v468_v12, 2 }
 0x2fc   :  { %v470_v14 = vadd.f32 %v469_v13, %v468_v12 }
 0x2fe   :  { %v471_v15 = vrot.slane %v470_v14, 1 }
 0x300   :  { %v472_v16 = vadd.f32 %v471_v15, %v470_v14 }
 0x302   :  { %624 = vpush %v472_v16 }
 0x333   :  { %s625_s11 = spop %624 }
 0x334   :  { %v481_v18 = vstv %s625_s11 }
 0x335   :  { %v482_v20 = vsel %vm480_vm8, %v481_v18, 0.0 }
 0x336   :  { %v484_v21 = vsel %vm478_vm9, %v483_v19, %v482_v20 }
 0x337   :  { %485 = vst [vmem:[#allocation2] sm:$0xff] %v484_v21 }
 0x338   :  { %649 = shalt.err (!%p646_p4)
}
 0x339   :  { %s650_s2 = scalar_lea.hbm %s813_s4, 128 }
 0x33a   :  { %p651_p5 = scmp.ne.s32.totalorder %s813_s4, %s650_s2  ;;  %p654_p6 = scmp.lt.u32.totalorder %s650_s2, %s813_s4 }
 0x33c   :  { %p656_p7 = pnand %p654_p6, %p651_p5 }
 0x33e   :  { %659 = shalt.err (!%p656_p7)
}
 0x33f   :  { %495 = dma.vmem_to_hbm [thread:$0]  %s493_s10, 128, %s813_s4, [#allocation3]  }
 0x340   :  { %660 = dma.done.wait [#allocation3], 128  }
 0x341   :  { %661 = vsyncadd [#allocation3], 4294967168 }
 0x342   :  { %499 = vsyncpa [#allocation3], 1 }

</bundles_post_ra>
